<compile_context>
chip_gen: v5e
topology: v5e:2x2
jax: 0.10.0
libtpu: 0.0.40
codegen_flags: <defaults>
</compile_context>

<pallas_src>
import math

import jax
import jax.numpy as jnp
from jax.experimental import pallas as pl
from jax.experimental.pallas import tpu as pltpu

_LANE = 128
_TARGET_TILE_BYTES = 2 * 1024 * 1024  # per buffer; ~8 MiB total w/ double-buffering


def _copy_kernel(x_ref, o_ref):
    # Lane-dense tile copy: unmasked vld/vst (except masked edge tiles),
    # purely HBM-bandwidth bound.
    o_ref[...] = x_ref[...]


def _sublane_align(itemsize: int) -> int:
    # f32 -> 8, bf16/f16 -> 16, int8/fp8 -> 32: keep packed sublanes dense.
    return max(8, 32 // max(itemsize, 1))


def _round_down(x: int, a: int) -> int:
    return (x // a) * a


def _aligned_tile(extent: int, align: int, cap: int) -> int:
    """Largest multiple of `align` <= min(cap, extent); full extent for tiny axes.

    Never returns the full extent for large misaligned axes (that could blow
    scoped VMEM); edge tiles are masked by Pallas via pl.cdiv grids instead.
    """
    if extent <= align:
        return max(extent, 1)          # full extent of a tiny axis is legal
    return max(_round_down(min(cap, extent), align), align)


def _slab_lane_width(total: int, max_lanes: int = 2048) -> int | None:
    """Largest multiple of 128 that divides `total`, capped at `max_lanes`."""
    if total % _LANE != 0:
        return None
    m = total // _LANE
    for d in range(min(max_lanes // _LANE, m), 0, -1):
        if m % d == 0:
            return d * _LANE
    return _LANE


def flatten(x: jax.Array) -> jax.Array:
    """Pallas equivalent of torch Flatten: x.view(x.size(0), -1)."""
    b = x.shape[0]
    feat = math.prod(x.shape[1:]) if x.ndim > 1 else 1
    total = b * feat
    itemsize = jnp.dtype(x.dtype).itemsize
    sub_align = _sublane_align(itemsize)

    if total == 0:
        # Nothing to copy; pure metadata reshape.
        return x.reshape(b, feat)

    cost = pl.CostEstimate(flops=0, transcendentals=0,
                           bytes_accessed=2 * total * itemsize)

    lane_w = _slab_lane_width(total)
    if lane_w is not None:
        # --- Dense-slab path (batch-independent tiling) -------------------
        # Free reshape to (rows, L); blocks span the full lane width L, so
        # each per-tile DMA is one contiguous HBM stream.
        rows = total // lane_w
        row_bytes = lane_w * itemsize
        cap_r = max(sub_align,
                    _round_down(_TARGET_TILE_BYTES // row_bytes, sub_align))

        if rows * row_bytes <= _TARGET_TILE_BYTES or rows < sub_align:
            tile_r = rows                                   # full extent: legal
        else:
            tile_r = min(cap_r, _round_down(rows, sub_align))

        # v7x megacore: keep >=2 grid blocks for non-trivial inputs so both
        # TensorCores share the copy (skip for tiny inputs: grid overhead).
        if (total * itemsize >= (1 << 19) and pl.cdiv(rows, tile_r) < 2
                and rows >= 2 * sub_align):
            tile_r = max(sub_align, _round_down(pl.cdiv(rows, 2), sub_align))

        grid = (pl.cdiv(rows, tile_r),)
        out = pl.pallas_call(
            _copy_kernel,
            out_shape=jax.ShapeDtypeStruct((rows, lane_w), x.dtype),
            grid_spec=pltpu.PrefetchScalarGridSpec(
                num_scalar_prefetch=0,
                grid=grid,
                in_specs=[pl.BlockSpec((tile_r, lane_w), lambda i: (i, 0))],
                out_specs=pl.BlockSpec((tile_r, lane_w), lambda i: (i, 0)),
            ),
            compiler_params=pltpu.CompilerParams(
                dimension_semantics=("parallel",),
            ),
            cost_estimate=cost,
        )(x.reshape(rows, lane_w))
        return out.reshape(b, feat)

    # --- Fallback path (total not a multiple of 128) ----------------------
    # Tile the (B, feat) view with aligned, capped blocks; edge tiles are
    # masked (no full-extent fallback that could exceed scoped VMEM).
    x2 = x.reshape(b, feat)
    tile_f = _aligned_tile(feat, _LANE, 2048)
    cap_b = max(sub_align,
                _round_down(_TARGET_TILE_BYTES // max(tile_f * itemsize, 1),
                            sub_align))
    tile_b = _aligned_tile(b, sub_align, cap_b)
    grid = (pl.cdiv(b, tile_b), pl.cdiv(feat, tile_f))

    return pl.pallas_call(
        _copy_kernel,
        out_shape=jax.ShapeDtypeStruct((b, feat), x.dtype),
        grid_spec=pltpu.PrefetchScalarGridSpec(
            num_scalar_prefetch=0,
            grid=grid,
            in_specs=[pl.BlockSpec((tile_b, tile_f), lambda i, j: (i, j))],
            out_specs=pl.BlockSpec((tile_b, tile_f), lambda i, j: (i, j)),
        ),
        compiler_params=pltpu.CompilerParams(
            dimension_semantics=("parallel", "parallel"),
        ),
        cost_estimate=cost,
    )(x2)


if __name__ == "__main__":
    key = jax.random.PRNGKey(0)
    # NCHW input, small shapes: batch=2, channels=4, spatial=16x16.
    x = jax.random.normal(key, (2, 4, 16, 16), dtype=jnp.float32)

    y = flatten(x)
    jax.block_until_ready(y)

    # Reference: plain JAX reshape (same row-major semantics as torch .view).
    y_ref = x.reshape(x.shape[0], -1)
    assert y.shape == (2, 4 * 16 * 16), y.shape
    assert y.dtype == x.dtype
    assert jnp.array_equal(y, y_ref)

    print("KERNEL_OK")
</pallas_src>

<mosaic_0001>
module attributes {stable_mosaic.version = 11 : i64} {
  func.func @_copy_kernel(%arg0: i32, %arg1: memref<1x2048xf32, #tpu.memory_space<vmem>>, %arg2: memref<1x2048xf32, #tpu.memory_space<vmem>>) attributes {dimension_semantics = [#tpu.dimension_semantics<parallel>], iteration_bounds = array<i64: 1>, scalar_prefetch = 0 : i64, scratch_operands = 0 : i64, tpu.core_type = #tpu.core_type<tc>, window_params = [{transform_indices = @transform_0, window_bounds = array<i64: 1, 2048>}, {transform_indices = @transform_1, window_bounds = array<i64: 1, 2048>}]} {
    %c0 = arith.constant 0 : index
    %c0_0 = arith.constant 0 : index
    %0 = vector.load %arg1[%c0, %c0_0] : memref<1x2048xf32, #tpu.memory_space<vmem>>, vector<1x2048xf32>
    %c0_1 = arith.constant 0 : index
    %c0_2 = arith.constant 0 : index
    %1 = vector.load %arg2[%c0_1, %c0_2] : memref<1x2048xf32, #tpu.memory_space<vmem>>, vector<1x2048xf32>
    tpu.vector_store %arg2[%c0_1, %c0_2], %0 {strides = array<i32>} : memref<1x2048xf32, #tpu.memory_space<vmem>>, vector<1x2048xf32>,
    return
  }
  func.func @transform_0(%arg0: i32) -> (i32, i32) {
    %c0_i32 = arith.constant 0 : i32
    %c0_i32_0 = arith.constant 0 : i32
    return %arg0, %c0_i32 : i32, i32
  }
  func.func @transform_1(%arg0: i32) -> (i32, i32) {
    %c0_i32 = arith.constant 0 : i32
    %c0_i32_0 = arith.constant 0 : i32
    return %arg0, %c0_i32 : i32, i32
  }
}

</mosaic_0001>

<bundles_post_ra>
// kernel: tpu_custom_call.1
= control target key start
LH: loop header
LB: loop body
LE: loop exit
PB: predicated region body
PF: predicated region fallthrough
CT: control target
= control target key end

     0   :  { %6 = vsyncpa [#allocation3], 0  ;;  %s116_s0 = inlined_call_operand.hbm [shape: f32[1,2048], index: 0, kind: input, shape index: {}]   ;;  %s117_s1 = inlined_call_operand.hbm [shape: f32[1,2048], index: 1, kind: output, shape index: {}]  }
   0x1   :  { %7 = vsyncpa [#allocation4], 0  ;;  %s13_s8 = sshll.u32 %s116_s0, 4  ;;  %s98_s9 = smov [#allocation2]   ;;  %s14_s8 = int_to_ptr.hbm [resolvable:$true] %s13_s8 }
   0x2   :  { %s15_s10 = sshll.u32 %s98_s9, 4  ;;  %s16_s10 = int_to_ptr.vmem [resolvable:$true] %s15_s10 }
   0x3   :  { %18 = dma.hbm_to_vmem [thread:$0]  %s14_s8, 256, %s16_s10, [#allocation3]  }
   0x4   :  { %94 = dma.done.wait [#allocation3], 256  }
   0x5   :  { %95 = vsyncadd [#allocation3], 4294967040  ;;  %s99_s11 = smov [#allocation5]   ;;  %s34_s15 = sshll.u32 %s117_s1, 4  ;;  %v23_v0 = vld [vmem:[#allocation2] sm:$0xff]  ;;  %v24_v1 = vld [vmem:[#allocation2 + $0x8] sm:$0xff]  ;;  %s35_s15 = int_to_ptr.hbm [resolvable:$true] %s34_s15 }
   0x6   :  { %s32_s12 = sshll.u32 %s99_s11, 4  ;;  %25 = vst [vmem:[#allocation5] sm:$0xff] %v23_v0  ;;  %s33_s12 = int_to_ptr.vmem [resolvable:$true] %s32_s12 }
   0x7   :  { %26 = vst [vmem:[#allocation5 + $0x8] sm:$0xff] %v24_v1 }
   0x8   :  { %37 = dma.vmem_to_hbm [thread:$0]  %s33_s12, 256, %s35_s15, [#allocation4]  }
   0x9   :  { %96 = dma.done.wait [#allocation4], 256  }
   0xa   :  { %97 = vsyncadd [#allocation4], 4294967040 }
   0xb   :  { %42 = vsyncpa [#allocation3], 1 }
   0xc   :  { %43 = vsyncpa [#allocation4], 1 }

</bundles_post_ra>
